<compile_context>
chip_gen: v5e
topology: v5e:2x2
jax: 0.10.0
libtpu: 0.0.40
codegen_flags: <defaults>
</compile_context>

<pallas_src>
import jax
import jax.numpy as jnp
from jax import lax
from jax.experimental import pallas as pl
from jax.experimental.pallas import tpu as pltpu


def _round_up(x, m):
    return ((x + m - 1) // m) * m


# ----------------------------------------------------------------------------
# Kernel 1: get_near_far + normalize_depth (per view), dense (rows, 128) blocks
# ----------------------------------------------------------------------------
def near_far_kernel(depth_ref, mask_ref, dnorm_ref, dun_ref, near_ref, far_ref):
    d = depth_ref[...]                                  # (1, R, 128)
    m = mask_ref[...] > 0.5                             # (1, R, 128) bool
    big = jnp.float32(3.0e38)
    cnt = jnp.sum(m.astype(jnp.float32), axis=(1, 2), keepdims=True)   # (1,1,1)
    near0 = jnp.min(jnp.where(m, d, big), axis=(1, 2), keepdims=True)
    far0 = jnp.max(jnp.where(m, d, -big), axis=(1, 2), keepdims=True)
    # Guard against an all-empty mask (torch would propagate inf/nan; we stay
    # finite and documented).
    has = cnt > 0.0
    near0 = jnp.where(has, near0, jnp.zeros_like(near0))
    far0 = jnp.where(has, far0, jnp.ones_like(far0))
    far = far0 + (far0 - near0) * 0.1
    near = near0 - (far - near0) * 0.02
    d_filled = jnp.where(m, d, far)                     # depth[~mask] = far_i
    rng = jnp.maximum(far - near, 1e-12)
    dnorm_ref[...] = (d_filled - near) / rng * 2.0 - 1.0          # exact divide
    # unnormalize_depth(normalize_depth(x)) == x exactly; the depth_refiner
    # Unet that sits between them in HumanModel is external, so the
    # unnormalized branch is exactly the filled depth.
    dun_ref[...] = d_filled
    near_ref[...] = near
    far_ref[...] = far


def near_far_normalize(depth, depth_mask):
    """depth, depth_mask: (V, H*W) f32 -> dnorm, dun (V, H*W), near, far (V,)."""
    V, HW = depth.shape
    HWp = _round_up(HW, 128)
    if HWp != HW:
        # Rare tail pad; padded pixels carry mask=0 so they never touch the
        # min/max reductions and are sliced away from the outputs.
        depth = jnp.pad(depth, ((0, 0), (0, HWp - HW)))
        depth_mask = jnp.pad(depth_mask, ((0, 0), (0, HWp - HW)))
    R = HWp // 128
    d3 = depth.reshape(V, R, 128)            # dense (sublane, lane) packing
    m3 = depth_mask.reshape(V, R, 128)
    view = lambda v: (v, 0, 0)
    dnorm, dun, near, far = pl.pallas_call(
        near_far_kernel,
        out_shape=(
            jax.ShapeDtypeStruct((V, R, 128), jnp.float32),
            jax.ShapeDtypeStruct((V, R, 128), jnp.float32),
            jax.ShapeDtypeStruct((V, 1, 1), jnp.float32),
            jax.ShapeDtypeStruct((V, 1, 1), jnp.float32),
        ),
        grid=(V,),
        in_specs=[pl.BlockSpec((1, R, 128), view),
                  pl.BlockSpec((1, R, 128), view)],
        out_specs=(pl.BlockSpec((1, R, 128), view),
                   pl.BlockSpec((1, R, 128), view),
                   pl.BlockSpec((1, 1, 1), view),
                   pl.BlockSpec((1, 1, 1), view)),
        compiler_params=pltpu.CompilerParams(
            dimension_semantics=("parallel",),
            # TODO(synk): at production resolutions (>=512x512) tile the row
            # axis as well (whole per-view maps are resident here).
            vmem_limit_bytes=32 * 1024 * 1024),
    )(d3, m3)
    return (dnorm.reshape(V, HWp)[:, :HW],
            dun.reshape(V, HWp)[:, :HW],
            near.reshape(V), far.reshape(V))


# ----------------------------------------------------------------------------
# Kernel 2: geo_mlp offset + xyz add (bf16 MXU matmuls, f32 accumulation)
# xyz and the output are lane-dense (8, N) slabs; last layer via dot_general.
# ----------------------------------------------------------------------------
def geo_kernel(xyz_ref, feat_ref, w1_ref, b1_ref, w2_ref, b2_ref,
               w3t_ref, b3t_ref, out_ref):
    # geo_mlp: Linear(128,128)-ReLU-Linear(128,128)-ReLU-Linear(128,3)-Tanh
    f = feat_ref[...].astype(jnp.bfloat16)              # cast in-kernel (cheap)
    h = jnp.dot(f, w1_ref[...],
                preferred_element_type=jnp.float32) + b1_ref[...]
    h = jnp.maximum(h, 0.0)
    h = jnp.dot(h.astype(jnp.bfloat16), w2_ref[...],
                preferred_element_type=jnp.float32) + b2_ref[...]
    h = jnp.maximum(h, 0.0)
    # Last layer emitted lane-dense: contract the 128-dim of w3^T (8,128) with
    # the 128-dim of h (tile_n,128) -> (8, tile_n); no materialized transpose.
    off = lax.dot_general(
        w3t_ref[...], h.astype(jnp.bfloat16),
        dimension_numbers=(((1,), (1,)), ((), ())),
        preferred_element_type=jnp.float32) + b3t_ref[...]
    # world2smpl -> smpl2world cancels exactly for orthogonal Rh; the tanh
    # offset is added in world space as in HumanModel.predict_gs. Padded rows
    # 3..7 stay exactly zero (w3t/b3t rows 3..7 are zero).
    out_ref[...] = xyz_ref[...] + jnp.tanh(off)


def geo_transform(xyz, guidance_feat, params, tile_n=4096):
    N = xyz.shape[0]
    C = guidance_feat.shape[1]

    if N <= tile_n:
        if N >= 2048 and N % 256 == 0:
            tile_n = N // 2        # keep >=2 grid steps for v7x megacore
        else:
            tile_n = N             # single full-extent block, no padding
    # else: tile_n (multiple of 128) with a cdiv grid; the partial tail block
    # is read/write masked by Pallas, garbage lanes never reach [:N].

    xyz8 = jnp.zeros((8, N), jnp.float32).at[:3, :].set(xyz.T)   # tiny slab
    w1 = params["w1"].astype(jnp.bfloat16)
    w2 = params["w2"].astype(jnp.bfloat16)
    w3t = jnp.zeros((8, C), jnp.bfloat16).at[:3, :].set(
        params["w3"].T.astype(jnp.bfloat16))
    b3t = jnp.zeros((8, 1), jnp.float32).at[:3, 0].set(params["b3"].reshape(-1))
    b1 = params["b1"].reshape(1, C).astype(jnp.float32)
    b2 = params["b2"].reshape(1, C).astype(jnp.float32)

    full = lambda i: (0, 0)
    lane_tiled = lambda i: (0, i)
    row_tiled = lambda i: (i, 0)
    out = pl.pallas_call(
        geo_kernel,
        out_shape=jax.ShapeDtypeStruct((8, N), jnp.float32),
        grid=(pl.cdiv(N, tile_n),),
        in_specs=[
            pl.BlockSpec((8, tile_n), lane_tiled),   # xyz (lane-dense)
            pl.BlockSpec((tile_n, C), row_tiled),    # guidance features (f32)
            pl.BlockSpec((C, C), full),              # w1 (bf16)
            pl.BlockSpec((1, C), full),              # b1
            pl.BlockSpec((C, C), full),              # w2 (bf16)
            pl.BlockSpec((1, C), full),              # b2
            pl.BlockSpec((8, C), full),              # w3^T (bf16, rows 3..7 = 0)
            pl.BlockSpec((8, 1), full),              # b3^T
        ],
        out_specs=pl.BlockSpec((8, tile_n), lane_tiled),
        compiler_params=pltpu.CompilerParams(
            dimension_semantics=("parallel",),
            vmem_limit_bytes=32 * 1024 * 1024),
    )(xyz8, guidance_feat, w1, b1, w2, b2, w3t, b3t)
    return out[:3, :].T                               # (N, 3)


# ----------------------------------------------------------------------------
# Kernel 3: compute_visibility formula + multi_view_fusion weighted rgb sum
# Point axis packed dense as (rows, 128); reduce over the leading V axis.
# ----------------------------------------------------------------------------
def vis_fuse_kernel(z_ref, d_ref, rgbs_ref, vis_ref, rgb_ref):
    z = z_ref[...]                                     # (V, rt, 128)
    d = d_ref[...]                                     # (V, rt, 128)
    vis = 1.0 - jnp.abs(z - d) / (z + 1e-9)            # exact divide
    vis_ref[...] = vis
    # TODO(synk): the MVF cross-view attention module is undefined upstream;
    # visibility-normalized weights are used as the attention stand-in.
    w = vis / (jnp.sum(vis, axis=0, keepdims=True) + 1e-8)
    rgb_ref[...] = jnp.sum(w[:, None] * rgbs_ref[...], axis=0)   # (3, rt, 128)


def visibility_fuse(zbuf, depth_proj, rgb_sampled, tile_rows=128):
    V, N = zbuf.shape
    Np = _round_up(N, 128)
    if Np != N:
        # Rare tail pad (z=1 keeps padded weights finite); sliced away below.
        zbuf = jnp.pad(zbuf, ((0, 0), (0, Np - N)), constant_values=1.0)
        depth_proj = jnp.pad(depth_proj, ((0, 0), (0, Np - N)),
                             constant_values=1.0)
        rgb_sampled = jnp.pad(rgb_sampled, ((0, 0), (0, 0), (0, Np - N)))
    R = Np // 128
    if R <= tile_rows:
        rt = R // 2 if (R >= 16 and R % 16 == 0) else R   # >=2 steps for v7x
    else:
        rt = tile_rows                                    # multiple of 8
    z = zbuf.reshape(V, R, 128)            # dense (sublane, lane) packing
    d = depth_proj.reshape(V, R, 128)
    rgbs = rgb_sampled.reshape(V, 3, R, 128)

    tiled3 = lambda i: (0, i, 0)
    tiled4 = lambda i: (0, 0, i, 0)
    vis, rgb = pl.pallas_call(
        vis_fuse_kernel,
        out_shape=(
            jax.ShapeDtypeStruct((V, R, 128), jnp.float32),
            jax.ShapeDtypeStruct((3, R, 128), jnp.float32),
        ),
        grid=(pl.cdiv(R, rt),),
        in_specs=[pl.BlockSpec((V, rt, 128), tiled3),
                  pl.BlockSpec((V, rt, 128), tiled3),
                  pl.BlockSpec((V, 3, rt, 128), tiled4)],
        out_specs=(pl.BlockSpec((V, rt, 128), tiled3),
                   pl.BlockSpec((3, rt, 128), tiled3)),
        compiler_params=pltpu.CompilerParams(
            dimension_semantics=("parallel",)),
    )(z, d, rgbs)
    return vis.reshape(V, Np)[:, :N], rgb.reshape(3, Np)[:, :N]


# ----------------------------------------------------------------------------
# Wrapper reproducing the portable parts of HumanModel.predict_gs
# ----------------------------------------------------------------------------
def human_model_forward(data, params):
    # near/far extraction + depth normalize (+ exact unnormalized branch), fused.
    depth_norm, depth_un, near, far = near_far_normalize(
        data["depth"], data["depth_mask"])
    # geo_mlp offset added in world space (Rh/Th round-trip cancels exactly,
    # so data["Rh"]/data["Th"] are only needed by the external voxelize step).
    xyz_world = geo_transform(data["xyz"], data["guidance_feat"], params)
    # visibility + multi-view rgb fusion.
    visibility, rgb = visibility_fuse(
        data["zbuf"], data["depth_proj"], data["rgb_sampled"])
    return xyz_world, depth_norm, depth_un, near, far, visibility, rgb


if __name__ == "__main__":
    key = jax.random.PRNGKey(0)
    ks = jax.random.split(key, 12)

    V, H, W = 3, 16, 16          # ref views, image size
    HW = H * W
    N = 256                      # masked point count
    Cf = 128                     # geo_mlp input feature dim

    depth = jax.random.uniform(ks[0], (V, HW), jnp.float32, 1.0, 3.0)
    depth_mask = (jax.random.uniform(ks[1], (V, HW)) > 0.3).astype(jnp.float32)
    xyz = jax.random.normal(ks[2], (N, 3), jnp.float32)
    guidance_feat = jax.random.normal(ks[3], (N, Cf), jnp.float32) * 0.1
    Rh = jnp.linalg.qr(jax.random.normal(ks[4], (3, 3)))[0].astype(jnp.float32)
    Th = jax.random.normal(ks[5], (1, 3), jnp.float32) * 0.1
    zbuf = jax.random.uniform(ks[6], (V, N), jnp.float32, 1.0, 3.0)
    depth_proj = zbuf + 0.05 * jax.random.normal(ks[7], (V, N), jnp.float32)
    rgb_sampled = jax.random.uniform(ks[8], (V, 3, N), jnp.float32)

    scale = 1.0 / jnp.sqrt(128.0)
    params = {
        "w1": jax.random.normal(ks[9], (128, 128), jnp.float32) * scale,
        "b1": jnp.zeros((1, 128), jnp.float32),
        "w2": jax.random.normal(ks[10], (128, 128), jnp.float32) * scale,
        "b2": jnp.zeros((1, 128), jnp.float32),
        "w3": jax.random.normal(ks[11], (128, 3), jnp.float32) * scale,
        "b3": jnp.zeros((1, 3), jnp.float32),
    }

    data = {
        "depth": depth,
        "depth_mask": depth_mask,
        "xyz": xyz,
        "guidance_feat": guidance_feat,
        "Rh": Rh,            # unused: world2smpl->smpl2world cancels exactly
        "Th": Th,            # (kept only for parity with the PyTorch inputs)
        "zbuf": zbuf,
        "depth_proj": depth_proj,
        "rgb_sampled": rgb_sampled,
    }

    outs = human_model_forward(data, params)
    outs = jax.block_until_ready(outs)

    # light sanity: every output is finite
    for o in outs:
        assert bool(jnp.all(jnp.isfinite(o))), "non-finite output"

    print("KERNEL_OK")
</pallas_src>

<mosaic_0001>
module attributes {stable_mosaic.version = 11 : i64} {
  func.func @near_far_kernel(%arg0: i32, %arg1: memref<1x2x128xf32, #tpu.memory_space<vmem>>, %arg2: memref<1x2x128xf32, #tpu.memory_space<vmem>>, %arg3: memref<1x2x128xf32, #tpu.memory_space<vmem>>, %arg4: memref<1x2x128xf32, #tpu.memory_space<vmem>>, %arg5: memref<1x1x1xf32, #tpu.memory_space<vmem>>, %arg6: memref<1x1x1xf32, #tpu.memory_space<vmem>>) attributes {dimension_semantics = [#tpu.dimension_semantics<parallel>], iteration_bounds = array<i64: 3>, scalar_prefetch = 0 : i64, scratch_operands = 0 : i64, tpu.core_type = #tpu.core_type<tc>, window_params = [{transform_indices = @transform_0, window_bounds = array<i64: 1, 2, 128>}, {transform_indices = @transform_1, window_bounds = array<i64: 1, 2, 128>}, {transform_indices = @transform_2, window_bounds = array<i64: 1, 2, 128>}, {transform_indices = @transform_3, window_bounds = array<i64: 1, 2, 128>}, {transform_indices = @transform_4, window_bounds = array<i64: 1, 1, 1>}, {transform_indices = @transform_5, window_bounds = array<i64: 1, 1, 1>}]} {
    %c0 = arith.constant 0 : index
    %c0_0 = arith.constant 0 : index
    %c0_1 = arith.constant 0 : index
    %0 = vector.load %arg1[%c0, %c0_0, %c0_1] : memref<1x2x128xf32, #tpu.memory_space<vmem>>, vector<1x2x128xf32>
    %c0_2 = arith.constant 0 : index
    %c0_3 = arith.constant 0 : index
    %c0_4 = arith.constant 0 : index
    %1 = vector.load %arg2[%c0_2, %c0_3, %c0_4] : memref<1x2x128xf32, #tpu.memory_space<vmem>>, vector<1x2x128xf32>
    %cst = arith.constant 5.000000e-01 : f32
    %2 = vector.broadcast %cst : f32 to vector<1x2x128xf32>
    %3 = arith.cmpf ogt, %1, %2 : vector<1x2x128xf32>
    %4 = arith.extui %3 : vector<1x2x128xi1> to vector<1x2x128xi32>
    %5 = arith.sitofp %4 : vector<1x2x128xi32> to vector<1x2x128xf32>
    %cst_5 = arith.constant dense<0.000000e+00> : vector<1xf32>
    %6 = vector.multi_reduction <add>, %5, %cst_5 [1, 2] : vector<1x2x128xf32> to vector<1xf32>
    %7 = vector.shape_cast %6 : vector<1xf32> to vector<1x1x1xf32>
    %cst_6 = arith.constant 3.000000e+38 : f32
    %8 = vector.broadcast %cst_6 : f32 to vector<1x2x128xf32>
    %9 = arith.select %3, %0, %8 : vector<1x2x128xi1>, vector<1x2x128xf32>
    %cst_7 = arith.constant dense<0x7F800000> : vector<1xf32>
    %10 = vector.multi_reduction <minimumf>, %9, %cst_7 [1, 2] : vector<1x2x128xf32> to vector<1xf32>
    %11 = vector.shape_cast %10 : vector<1xf32> to vector<1x1x1xf32>
    %cst_8 = arith.constant 0.000000e+00 : f32
    %cst_9 = arith.constant 3.000000e+38 : f32
    %12 = arith.subf %cst_8, %cst_9 : f32
    %13 = vector.broadcast %12 : f32 to vector<1x2x128xf32>
    %14 = arith.select %3, %0, %13 : vector<1x2x128xi1>, vector<1x2x128xf32>
    %cst_10 = arith.constant dense<0xFF800000> : vector<1xf32>
    %15 = vector.multi_reduction <maximumf>, %14, %cst_10 [1, 2] : vector<1x2x128xf32> to vector<1xf32>
    %16 = vector.shape_cast %15 : vector<1xf32> to vector<1x1x1xf32>
    %cst_11 = arith.constant 0.000000e+00 : f32
    %17 = vector.broadcast %cst_11 : f32 to vector<1x1x1xf32>
    %18 = arith.cmpf ogt, %7, %17 : vector<1x1x1xf32>
    %cst_12 = arith.constant 0.000000e+00 : f32
    %19 = vector.broadcast %cst_12 : f32 to vector<1x1x1xf32>
    %20 = arith.select %18, %11, %19 : vector<1x1x1xi1>, vector<1x1x1xf32>
    %cst_13 = arith.constant 1.000000e+00 : f32
    %21 = vector.broadcast %cst_13 : f32 to vector<1x1x1xf32>
    %22 = arith.select %18, %16, %21 : vector<1x1x1xi1>, vector<1x1x1xf32>
    %23 = arith.subf %22, %20 : vector<1x1x1xf32>
    %cst_14 = arith.constant 1.000000e-01 : f32
    %24 = vector.broadcast %cst_14 : f32 to vector<1x1x1xf32>
    %25 = arith.mulf %23, %24 : vector<1x1x1xf32>
    %26 = arith.addf %22, %25 : vector<1x1x1xf32>
    %27 = arith.subf %26, %20 : vector<1x1x1xf32>
    %cst_15 = arith.constant 2.000000e-02 : f32
    %28 = vector.broadcast %cst_15 : f32 to vector<1x1x1xf32>
    %29 = arith.mulf %27, %28 : vector<1x1x1xf32>
    %30 = arith.subf %20, %29 : vector<1x1x1xf32>
    %31 = vector.shape_cast %26 : vector<1x1x1xf32> to vector<1x1x1xf32>
    %32 = vector.broadcast %31 : vector<1x1x1xf32> to vector<1x2x128xf32>
    %33 = arith.select %3, %0, %32 : vector<1x2x128xi1>, vector<1x2x128xf32>
    %34 = arith.subf %26, %30 : vector<1x1x1xf32>
    %cst_16 = arith.constant 9.99999996E-13 : f32
    %35 = vector.broadcast %cst_16 : f32 to vector<1x1x1xf32>
    %36 = arith.maximumf %34, %35 : vector<1x1x1xf32>
    %37 = vector.broadcast %30 : vector<1x1x1xf32> to vector<1x2x128xf32>
    %38 = arith.subf %33, %37 : vector<1x2x128xf32>
    %39 = vector.broadcast %36 : vector<1x1x1xf32> to vector<1x2x128xf32>
    %40 = arith.divf %38, %39 : vector<1x2x128xf32>
    %cst_17 = arith.constant 2.000000e+00 : f32
    %41 = vector.broadcast %cst_17 : f32 to vector<1x2x128xf32>
    %42 = arith.mulf %40, %41 : vector<1x2x128xf32>
    %cst_18 = arith.constant 1.000000e+00 : f32
    %43 = vector.broadcast %cst_18 : f32 to vector<1x2x128xf32>
    %44 = arith.subf %42, %43 : vector<1x2x128xf32>
    %c0_19 = arith.constant 0 : index
    %c0_20 = arith.constant 0 : index
    %c0_21 = arith.constant 0 : index
    %45 = vector.load %arg3[%c0_19, %c0_20, %c0_21] : memref<1x2x128xf32, #tpu.memory_space<vmem>>, vector<1x2x128xf32>
    tpu.vector_store %arg3[%c0_19, %c0_20, %c0_21], %44 {strides = array<i32>} : memref<1x2x128xf32, #tpu.memory_space<vmem>>, vector<1x2x128xf32>,
    %c0_22 = arith.constant 0 : index
    %c0_23 = arith.constant 0 : index
    %c0_24 = arith.constant 0 : index
    %46 = vector.load %arg4[%c0_22, %c0_23, %c0_24] : memref<1x2x128xf32, #tpu.memory_space<vmem>>, vector<1x2x128xf32>
    tpu.vector_store %arg4[%c0_22, %c0_23, %c0_24], %33 {strides = array<i32>} : memref<1x2x128xf32, #tpu.memory_space<vmem>>, vector<1x2x128xf32>,
    %c0_25 = arith.constant 0 : index
    %c0_26 = arith.constant 0 : index
    %c0_27 = arith.constant 0 : index
    %47 = vector.load %arg5[%c0_25, %c0_26, %c0_27] : memref<1x1x1xf32, #tpu.memory_space<vmem>>, vector<1x1x1xf32>
    tpu.vector_store %arg5[%c0_25, %c0_26, %c0_27], %30 {strides = array<i32>} : memref<1x1x1xf32, #tpu.memory_space<vmem>>, vector<1x1x1xf32>,
    %c0_28 = arith.constant 0 : index
    %c0_29 = arith.constant 0 : index
    %c0_30 = arith.constant 0 : index
    %48 = vector.load %arg6[%c0_28, %c0_29, %c0_30] : memref<1x1x1xf32, #tpu.memory_space<vmem>>, vector<1x1x1xf32>
    tpu.vector_store %arg6[%c0_28, %c0_29, %c0_30], %26 {strides = array<i32>} : memref<1x1x1xf32, #tpu.memory_space<vmem>>, vector<1x1x1xf32>,
    return
  }
  func.func @transform_0(%arg0: i32) -> (i32, i32, i32) {
    %c0_i32 = arith.constant 0 : i32
    %c0_i32_0 = arith.constant 0 : i32
    %c0_i32_1 = arith.constant 0 : i32
    return %arg0, %c0_i32, %c0_i32_0 : i32, i32, i32
  }
  func.func @transform_1(%arg0: i32) -> (i32, i32, i32) {
    %c0_i32 = arith.constant 0 : i32
    %c0_i32_0 = arith.constant 0 : i32
    %c0_i32_1 = arith.constant 0 : i32
    return %arg0, %c0_i32, %c0_i32_0 : i32, i32, i32
  }
  func.func @transform_2(%arg0: i32) -> (i32, i32, i32) {
    %c0_i32 = arith.constant 0 : i32
    %c0_i32_0 = arith.constant 0 : i32
    %c0_i32_1 = arith.constant 0 : i32
    return %arg0, %c0_i32, %c0_i32_0 : i32, i32, i32
  }
  func.func @transform_3(%arg0: i32) -> (i32, i32, i32) {
    %c0_i32 = arith.constant 0 : i32
    %c0_i32_0 = arith.constant 0 : i32
    %c0_i32_1 = arith.constant 0 : i32
    return %arg0, %c0_i32, %c0_i32_0 : i32, i32, i32
  }
  func.func @transform_4(%arg0: i32) -> (i32, i32, i32) {
    %c0_i32 = arith.constant 0 : i32
    %c0_i32_0 = arith.constant 0 : i32
    %c0_i32_1 = arith.constant 0 : i32
    return %arg0, %c0_i32, %c0_i32_0 : i32, i32, i32
  }
  func.func @transform_5(%arg0: i32) -> (i32, i32, i32) {
    %c0_i32 = arith.constant 0 : i32
    %c0_i32_0 = arith.constant 0 : i32
    %c0_i32_1 = arith.constant 0 : i32
    return %arg0, %c0_i32, %c0_i32_0 : i32, i32, i32
  }
}

</mosaic_0001>

<bundles_post_ra>
// kernel: tpu_custom_call.1
= control target key start
LH: loop header
LB: loop body
LE: loop exit
PB: predicated region body
PF: predicated region fallthrough
CT: control target
= control target key end

     0   :  { %s1063_s0 = inlined_call_operand.hbm [shape: f32[3,2,128], index: 0, kind: input, shape index: {}]   ;;  %s1064_s1 = inlined_call_operand.hbm [shape: f32[3,2,128], index: 1, kind: input, shape index: {}]   ;;  %s1065_s2 = inlined_call_operand.hbm [shape: f32[3,2,128], index: 2, kind: output, shape index: {0}]   ;;  %s1066_s3 = inlined_call_operand.hbm [shape: f32[3,2,128], index: 3, kind: output, shape index: {1}]   ;;  %s1067_s4 = inlined_call_operand.vmem [shape: f32[3,1,1], index: 4, kind: output, shape index: {2}]   ;;  %s1068_s5 = inlined_call_operand.vmem [shape: f32[3,1,1], index: 5, kind: output, shape index: {3}]  }
   0x1   :  { %1069 = sst [smem:[#allocation15_spill]] %s1063_s0 }
   0x2   :  { %11 = vsyncpa [#allocation3], 0 }
   0x3   :  { %13 = vsyncpa [#allocation3 + $0x1], 0 }
   0x4   :  { %14 = vsyncpa [#allocation6], 0 }
   0x5   :  { %16 = vsyncpa [#allocation6 + $0x1], 0 }
   0x6   :  { %17 = vsyncpa [#allocation4], 0 }
   0x7   :  { %19 = vsyncpa [#allocation4 + $0x1], 0 }
   0x8   :  { %20 = vsyncpa [#allocation9], 0 }
   0x9   :  { %22 = vsyncpa [#allocation9 + $0x1], 0  ;;  %s863_s18 = smov 0   ;;  %s865_s19 = smov 0  }
   0xa   :  { %s867_s20 = smov 0   ;;  %s869_s21 = smov 0  }
   0xb LB: > { %s884_s22 = sadd.s32 4294967295, %s830_s21   ;;  %s589_s23 = sadd.s32 4294967294, %s830_s21   ;;  %s830_s21 = sphi %s869_s21, %s1082_s21   ;;  %s826_s20 = sphi %s867_s20, %s1081_s20   ;;  %s822_s19 = sphi %s865_s19, %s1080_s19   ;;  %s818_s18 = sphi %s863_s18, %s1079_s18  }
   0xc   : > { %s888_s24 = sadd.s32 1, %s830_s21   ;;  %s35_s25 = sadd.s32 1, %s826_s20 }
   0xd   : > { %s32_s26 = ssub.s32 %s830_s21, %s888_s24  ;;  %p42_p0 = scmp.ne.s32.totalorder %s826_s20, %s822_s19 }
   0xe   : > { %p33_p1 = scmp.eq.s32.totalorder %s32_s26, 0  ;;  %p43_p2 = scmp.eq.s32.totalorder %s830_s21, 0 }
   0xf   : > { %p48_p3 = scmp.ne.s32.totalorder %s822_s19, %s818_s18  ;;  %p49_p4 = scmp.eq.s32.totalorder %s884_s22, 0 }
  0x10   : > { %s900_s27 = scalar_select %p33_p1, %s826_s20, %s35_s25  }
  0x11   : > { %p902_p5 = por %p43_p2, %p42_p0  ;;  %p906_p6 = por %p49_p4, %p48_p3 }
  0x12   : > { %1070 = sst [smem:[#allocation14_spill]] %s900_s27  ;;  %p98_p7 = scmp.eq.s32.totalorder %s884_s22, 2 }
  0x13   : > { %p104_p8 = scmp.eq.s32.totalorder %s589_s23, 2  ;;  %p631_p9 = scmp.lt.s32.totalorder %s830_s21, 3 }
  0x14   : > { %p912_p10 = por %p98_p7, %p42_p0  ;;  %s921_s7 = sand.u32 1, %s826_s20  }
  0x15   : > { %p916_p11 = por %p104_p8, %p48_p3  ;;  %s593_s8 = sshll.u32 %s830_s21, 1 }
  0x16   : > { %s592_s9 = sshll.u32 %s921_s7, 1  ;;  %s1075_s0 = sld [smem:[#allocation15_spill]] }
  0x17   : > { %s206_s14 = scalar_lea.vmem [#allocation2], %s592_s9  ;;  %p930_p12 = pnand %p631_p9, %p902_p5 }
  0x18   : > { %s214_s15 = sshll.u32 %s206_s14, 4  ;;  %p596_p13 = scmp.ge.s32.totalorder %s830_s21, 1  ;;  %s215_s15 = int_to_ptr.vmem [resolvable:$true] %s214_s15 }
  0x19   : > { %p238_p0 = scmp.lt.s32.totalorder %s830_s21, 4  ;;  %s203_s17 = scalar_lea.sflag [#allocation3], %s921_s7 }
  0x1a   : > { %p672_p2 = pneg %p930_p12 }
  0x1c   : > { %s210_s12 = scalar_lea.hbm %s1075_s0, %s593_s8  ;;  %s675_s10 = scalar_lea.hbm %s1075_s0, 6 }
  0x1d   : > { %s212_s13 = sshll.u32 %s210_s12, 4  ;;  %s213_s13 = int_to_ptr.hbm [resolvable:$true] %s212_s13 }
  0x1e   : > { %s668_s23 = sshra.s32 %s213_s13, 4  ;;  %s669_s23 = int_to_ptr.hbm [resolvable:$true] %s668_s23 }
  0x1f   : > { %s670_s25 = scalar_lea.hbm %s669_s23, 2  ;;  %p676_p5 = scmp.lt.s32.totalorder %s669_s23, %s1075_s0 }
  0x20   : > { %p671_p1 = scmp.ne.s32.totalorder %s669_s23, %s670_s25  ;;  %p677_p7 = scmp.lt.s32.totalorder %s675_s10, %s670_s25 }
  0x22   : > { %p673_p3 = pnand %p672_p2, %p671_p1  ;;  %p678_p8 = por %p677_p7, %p676_p5 }
  0x24   : > { %p674_p4 = pneg %p673_p3 }
  0x26   : > { %p679_p9 = pnand %p678_p8, %p674_p4 }
  0x28   : > { %682 = shalt.err (!%p679_p9)
}
  0x29   : > { %620 = dma.hbm_to_vmem [thread:$0]  (!%p930_p12), %s213_s13, 32, %s215_s15, %s203_s17  }
  0x2a   : > { %p954_p1 = pnand %p596_p13, %p238_p0  ;;  %s229_s23 = scalar_lea.hbm %s1064_s1, %s593_s8 }
  0x2b   : > { %s231_s25 = sshll.u32 %s229_s23, 4  ;;  %s225_s10 = scalar_lea.vmem [#allocation5], %s592_s9  ;;  %s232_s25 = int_to_ptr.hbm [resolvable:$true] %s231_s25 }
  0x2c   : > { %s233_s11 = sshll.u32 %s225_s10, 4  ;;  %s222_s12 = scalar_lea.sflag [#allocation6], %s921_s7  ;;  %s234_s11 = int_to_ptr.vmem [resolvable:$true] %s233_s11 }
  0x2d   : > { %s698_s0 = sshra.s32 %s232_s25, 4  ;;  %s705_s17 = scalar_lea.hbm %s1064_s1, 6  ;;  %s699_s0 = int_to_ptr.hbm [resolvable:$true] %s698_s0 }
  0x2e   : > { %s700_s27 = scalar_lea.hbm %s699_s0, 2  ;;  %p706_p4 = scmp.lt.s32.totalorder %s699_s0, %s1064_s1 }
  0x2f   : > { %p701_p3 = scmp.ne.s32.totalorder %s699_s0, %s700_s27  ;;  %p707_p5 = scmp.lt.s32.totalorder %s705_s17, %s700_s27 }
  0x31   : > { %p703_p13 = pnand %p701_p3, %p672_p2  ;;  %p708_p7 = por %p707_p5, %p706_p4 }
  0x33   : > { %p704_p0 = pneg %p703_p13 }
  0x35   : > { %p709_p8 = pnand %p708_p7, %p704_p0 }
  0x37   : > { %712 = shalt.err (!%p709_p8)
}
  0x38   : > { %623 = dma.hbm_to_vmem [thread:$0]  (!%p930_p12), %s232_s25, 32, %s234_s11, %s222_s12  }
  0x39   : > { %242 = sbr.rel (%p954_p1) target bundleno = 248 (0xf8), region = 28  ;;  %s976_s7 = sand.u32 (!%p954_p1), 1, %s822_s19  }
  0x3a   : > { %s979_s9 = sshll.u32 (!%p954_p1), %s976_s7, 1  ;;  %s245_s0 = scalar_lea.sflag (!%p954_p1), [#allocation3], %s976_s7 }
  0x3b   : > { %s248_s27 = scalar_lea.vmem (!%p954_p1), [#allocation2], %s979_s9 }
  0x3e   : > { %801 = dma.done.wait (%p906_p6), %s245_s0, 32  }
  0x3f   : > { %803 = vsyncadd (%p906_p6), %s245_s0, 4294967264  ;;  %s255_s16 = scalar_lea.sflag [#allocation6], %s976_s7  ;;  %s258_s14 = scalar_lea.vmem [#allocation5], %s979_s9 }
  0x40   : > { %805 = dma.done.wait (%p906_p6), %s255_s16, 32  }
  0x41   : > { %807 = vsyncadd (%p906_p6), %s255_s16, 4294967264  ;;  %v309_v0 = vld [vmem:[%s258_s14] sm:$0x3]  ;;  %vm313_vm0 = vcmask 1041408   ;;  %v308_v1 = vld [vmem:[%s248_s27] sm:$0x3] }
  0x42   : > { %vm310_vm1 = vcmp.gt.f32.partialorder %v309_v0, 0.5  ;;  %v832_v2 = vmov 0.0   ;;  %p302_p6 = scmp.lt.s32.totalorder %s884_s22, 2  ;;  %s605_s29 = sshll.u32 %s884_s22, 1  ;;  %vm375_vm3 = vcmask 0  }
  0x43   : > { %v601_v3 = vsel %vm310_vm1, 1.0, %v832_v2  ;;  %v333_v4 = vsel %vm310_vm1, %v308_v1, -3e+38  ;;  %v323_v7 = vsel %vm310_vm1, %v308_v1, 3e+38  ;;  %s414_s10 = scalar_lea.hbm %s1066_s3, %s605_s29  ;;  %s291_s11 = scalar_lea.vmem [#allocation8], %s979_s9 }
  0x44   : > { %v314_v5 = vsel %vm313_vm0, %v601_v3, 0.0  ;;  %v334_v6 = vsel %vm313_vm0, %v333_v4, -inf  ;;  %v324_v8 = vsel %vm313_vm0, %v323_v7, inf  ;;  %s999_s28 = scalar_select %p302_p6, %s884_s22, 2 }
  0x45   : > { %315 = vadd.xlane.f32.xlu0 %v314_v5  ;;  %335 = vmax.xlane.f32.xlu1 %v334_v6  ;;  %s416_s12 = sshll.u32 %s291_s11, 4  ;;  %s418_s13 = sshll.u32 %s414_s10, 4  ;;  %s417_s12 = int_to_ptr.vmem [resolvable:$true] %s416_s12  ;;  %s419_s13 = int_to_ptr.hbm [resolvable:$true] %s418_s13 }
  0x46   : > { %s307_s26 = scalar_lea.vmem %s1068_s5, %s999_s28  ;;  %s384_s8 = scalar_lea.sflag [#allocation9], %s976_s7 }
  0x47   : > { %s742_s0 = sshra.s32 %s419_s13, 4  ;;  %s748_s23 = scalar_lea.hbm %s1066_s3, 6  ;;  %s743_s0 = int_to_ptr.hbm [resolvable:$true] %s742_s0 }
  0x48   : > { %s744_s27 = scalar_lea.hbm %s743_s0, 2  ;;  %p749_p1 = scmp.lt.s32.totalorder %s743_s0, %s1066_s3 }
  0x49   : > { %p745_p12 = scmp.ne.s32.totalorder %s743_s0, %s744_s27  ;;  %p750_p3 = scmp.lt.s32.totalorder %s748_s23, %s744_s27 }
  0x4b   : > { %p746_p2 = pnand %p745_p12, %p912_p10  ;;  %p751_p13 = por %p750_p3, %p749_p1 }
  0x4d   : > { %325 = vmin.xlane.f32.xlu0 %v324_v8  ;;  %p747_p9 = pneg %p746_p2 }
  0x4f   : > { %p752_p0 = pnand %p751_p13, %p747_p9 }
  0xb8   : > { %v316_v9 = vpop.xlane.xlu0 %315  ;;  %v336_v10 = vpop.xlane.xlu1 %335 }
  0xb9   : > { %v317_v11 = vrot.slane %v316_v9, 4  ;;  %v337_v12 = vrot.slane %v336_v10, 4 }
  0xbb   : > { %v318_v13 = vadd.f32 %v317_v11, %v316_v9  ;;  %v338_v14 = vmax.f32 %v336_v10, %v337_v12 }
  0xbd   : > { %v319_v15 = vrot.slane %v318_v13, 2  ;;  %v339_v16 = vrot.slane %v338_v14, 2 }
  0xbf   : > { %v320_v17 = vadd.f32 %v319_v15, %v318_v13  ;;  %v340_v19 = vmax.f32 %v338_v14, %v339_v16 }
  0xc0   : > { %v326_v18 = vpop.xlane.xlu0 %325 }
  0xc1   : > { %v327_v20 = vrot.slane %v326_v18, 4  ;;  %v321_v21 = vrot.slane %v320_v17, 1  ;;  %v341_v23 = vrot.slane %v340_v19, 1 }
  0xc3   : > { %v328_v22 = vmin.f32 %v326_v18, %v327_v20  ;;  %v322_v25 = vadd.f32 %v321_v21, %v320_v17  ;;  %v342_v27 = vmax.f32 %v340_v19, %v341_v23 }
  0xc5   : > { %v329_v24 = vrot.slane %v328_v22, 2  ;;  %vm343_vm2 = vcmp.gt.f32.partialorder %v322_v25, 0.0 }
  0xc6   : > { %v345_v30 = vsel %vm343_vm2, %v342_v27, 1.0 }
  0xc7   : > { %v330_v26 = vmin.f32 %v328_v22, %v329_v24 }
  0xc9   : > { %v331_v28 = vrot.slane %v330_v26, 1 }
  0xcb   : > { %v332_v29 = vmin.f32 %v330_v26, %v331_v28 }
  0xcd   : > { %v344_v31 = vsel %vm343_vm2, %v332_v29, 0.0 }
  0xce   : > { %v346_v32 = vsub.f32 %v345_v30, %v344_v31 }
  0xd0   : > { %v347_v33 = vmul.f32 0.1, %v346_v32 }
  0xd2   : > { %v348_v34 = vadd.f32 %v347_v33, %v345_v30 }
  0xd4   : > { %v349_v35 = vsub.f32 %v348_v34, %v344_v31  ;;  %377 = vst.msk [vmem:[%s307_s26] sm:$0x1] %vm375_vm3, %v348_v34  ;;  %v352_v36 = vsel %vm310_vm1, %v308_v1, %v348_v34 }
  0xd5   : > { %374 = vst [vmem:[%s291_s11] sm:$0x3] %v352_v36 }
  0xd6   : > { %v350_v37 = vmul.f32 0.02, %v349_v35 }
  0xd7   : > { %755 = shalt.err (!%p752_p0)
}
  0xd8   : > { %614 = dma.vmem_to_hbm [thread:$0]  (%p912_p10), %s417_s12, 32, %s419_s13, %s384_s8   ;;  %v351_v38 = vsub.f32 %v344_v31, %v350_v37 }
  0xd9   : > { %s304_s17 = scalar_lea.vmem %s1067_s4, %s999_s28  ;;  %s400_s13 = scalar_lea.hbm %s1065_s2, %s605_s29 }
  0xda   : > { %v353_v39 = vsub.f32 %v348_v34, %v351_v38  ;;  %376 = vst.msk [vmem:[%s304_s17] sm:$0x1] %vm375_vm3, %v351_v38  ;;  %v355_v49 = vsub.f32 %v352_v36, %v351_v38  ;;  %s284_s26 = scalar_lea.vmem [#allocation7], %s979_s9  ;;  %s404_s0 = sshll.u32 %s400_s13, 4  ;;  %s405_s0 = int_to_ptr.hbm [resolvable:$true] %s404_s0 }
  0xdb   : > { %s402_s8 = sshll.u32 %s284_s26, 4  ;;  %s379_s27 = scalar_lea.sflag [#allocation4], %s976_s7  ;;  %s403_s8 = int_to_ptr.vmem [resolvable:$true] %s402_s8 }
  0xdc   : > { %v354_v40 = vmax.f32 %v353_v39, 1e-12  ;;  %s770_s16 = sshra.s32 %s405_s0, 4  ;;  %s776_s23 = scalar_lea.hbm %s1065_s2, 6  ;;  %s771_s16 = int_to_ptr.hbm [resolvable:$true] %s770_s16 }
  0xdd   : > { %s772_s14 = scalar_lea.hbm %s771_s16, 2  ;;  %p777_p8 = scmp.lt.s32.totalorder %s771_s16, %s1065_s2 }
  0xde   : > { %666 = vrcp.f32 %v354_v40  ;;  %v367_v44 = vand.u32 2147483648, %v354_v40  ;;  %v365_v46 = vand.u32 2147483647, %v354_v40  ;;  %vm361_vm5 = vweird.f32 %v354_v40  ;;  %p773_p4 = scmp.ne.s32.totalorder %s771_s16, %s772_s14  ;;  %p778_p6 = scmp.lt.s32.totalorder %s776_s23, %s772_s14 }
  0xe0   : > { %v368_v48 = vor.u32 1.1754944e-38, %v367_v44  ;;  %vm366_vm7 = vcmp.eq.f32.partialorder %v365_v46, 8.507059e+37  ;;  %p774_p5 = pnand %p773_p4, %p912_p10  ;;  %p779_p12 = por %p778_p6, %p777_p8 }
  0xe2   : > { %p775_p7 = pneg %p774_p5 }
  0xe4   : > { %v667_v41 = vpop.eup %666  ;;  %p780_p2 = pnand %p779_p12, %p775_p7 }
  0xe5   : > { %v357_v42 = vmul.f32 %v667_v41, %v354_v40  ;;  %vm362_vm4 = vweird.f32 %v667_v41 }
  0xe6   : > { %vm363_vm6 = vmor %vm361_vm5, %vm362_vm4 }
  0xe7   : > { %v358_v43 = vsub.f32 1.0, %v357_v42 }
  0xe9   : > { %v359_v45 = vmul.f32 %v667_v41, %v358_v43 }
  0xeb   : > { %v360_v47 = vadd.f32 %v667_v41, %v359_v45 }
  0xed   : > { %v364_v50 = vsel %vm363_vm6, %v667_v41, %v360_v47 }
  0xee   : > { %v369_v51 = vsel %vm366_vm7, %v368_v48, %v364_v50 }
  0xef   : > { %v370_v52 = vmul.f32 %v369_v51, %v355_v49 }
  0xf1   : > { %v371_v53 = vmul.f32 2.0, %v370_v52 }
  0xf3   : > { %v602_v54 = vadd.f32 -1.0, %v371_v53 }
  0xf5   : > { %373 = vst [vmem:[%s284_s26] sm:$0x3] %v602_v54 }
  0xf6   : > { %783 = shalt.err (!%p780_p2)
}
  0xf7   : > { %613 = dma.vmem_to_hbm [thread:$0]  (%p912_p10), %s403_s8, 32, %s405_s0, %s379_s27  }
  0xf8 PF: > { %p632_p9 = scmp.ge.s32.totalorder %s830_s21, 2  ;;  %s436_s7 = sand.u32 1, %s818_s18  }
  0xf9   : > { %s437_s10 = scalar_lea.sflag [#allocation4], %s436_s7 }
  0xfa   : > { %p625_p1 = pnand %p632_p9, %p916_p11 }
  0xfc   : > { %p626_p3 = pneg %p625_p1 }
  0xfe   : > { %809 = dma.done.wait (%p626_p3), %s437_s10, 32  }
  0xff   : > { %811 = vsyncadd (%p626_p3), %s437_s10, 4294967264  ;;  %s447_s11 = scalar_lea.sflag [#allocation9], %s436_s7 }
 0x100   : > { %813 = dma.done.wait (%p626_p3), %s447_s11, 32  }
 0x101   : > { %815 = vsyncadd (%p626_p3), %s447_s11, 4294967264  ;;  %s1078_s30 = sld [smem:[#allocation14_spill]]  ;;  %p25_p10 = scmp.ge.s32.totalorder %s888_s24, 5  }
 0x102   : > { %s1079_s18 = smov %s822_s19  ;;  %s1080_s19 = smov %s826_s20 }
 0x103   : > { %s1082_s21 = smov %s888_s24  ;;  %27 = sbr.rel (!%p25_p10) target bundleno = 11 (0xb), region = 127 }
 0x107   : > { %s1081_s20 = smov %s1078_s30 }
 0x108   :  { %465 = vsyncpa [#allocation3], 1 }
 0x109   :  { %467 = vsyncpa [#allocation3 + $0x1], 1 }
 0x10a   :  { %468 = vsyncpa [#allocation6], 1 }
 0x10b   :  { %470 = vsyncpa [#allocation6 + $0x1], 1 }
 0x10c   :  { %471 = vsyncpa [#allocation4], 1 }
 0x10d   :  { %473 = vsyncpa [#allocation4 + $0x1], 1 }
 0x10e   :  { %474 = vsyncpa [#allocation9], 1 }
 0x10f   :  { %476 = vsyncpa [#allocation9 + $0x1], 1 }

</bundles_post_ra>
